<compile_context>
chip_gen: v7x
topology: tpu7x:2x2x1
jax: 0.10.0
libtpu: 0.0.40
codegen_flags: <defaults>
</compile_context>

<pallas_src>
import jax
import jax.numpy as jnp
import numpy as np
from jax.experimental import pallas as pl
from jax.experimental.pallas import tpu as pltpu


# ---------------------------------------------------------------------------
# Fused kernel: folded-BN + ReLU + (1x1 conv with 2x2 avg-pool folded into K)
# ---------------------------------------------------------------------------
def _transition_kernel(x_ref, w_ref, scale_ref, bias_ref, o_ref):
    # x_ref:     (tile_m, K4)     bf16  -- rows = output pixels, cols = 2x2 window x Cin
    # w_ref:     (K4, Cout_b)     bf16  -- conv weight tiled 4x and pre-scaled by 0.25
    # scale/bias:(1, K4)          bf16  -- eval-mode BN folded, tiled 4x
    z = x_ref[...] * scale_ref[...] + bias_ref[...]          # BatchNorm (folded), bf16
    z = jnp.maximum(z, jnp.zeros((), z.dtype))                # ReLU
    y = jnp.dot(z, w_ref[...], preferred_element_type=jnp.float32)  # conv1x1 + avgpool
    o_ref[...] = y.astype(o_ref.dtype)                        # bf16 store (halve HBM write)


def _vmem_capacity_bytes():
    try:
        return int(pltpu.get_tpu_info().vmem_capacity_bytes)
    except Exception:
        return 64 << 20            # conservative fallback (v7x per-TensorCore)


def _pick_tile_m(M, K4, Cout_b, vmem_cap):
    """Row-tile sized from a hardware-derived VMEM budget, with full accounting:
    x double-buffer + bf16 z temp (6*K4 B/row), out double-buffer (bf16) + f32 acc
    (8*Cout_b B/row), plus the double-buffered weight block."""
    budget = min(vmem_cap // 4, 24 << 20)
    fixed = 2 * K4 * Cout_b * 2 + 4 * K4 * 2          # weight dbuf (bf16) + scale/bias dbuf
    per_row = 6 * K4 + 8 * Cout_b
    tm = (budget - fixed) // max(per_row, 1)
    tm = int(min(tm, 2048, M))
    if tm < 16:
        return int(M)              # tiny / weight-dominated: single full block
    tm = (tm // 16) * 16           # multiple of 16 (valid sublane tiling for bf16)
    # v7x has 2 TensorCores: make sure the 1-D "parallel" grid has >= 2 steps.
    if tm >= M and M >= 32:
        tm = min(tm, ((M + 1) // 2 + 15) // 16 * 16)
    return tm


# ---------------------------------------------------------------------------
# Public wrapper: NCHW in -> NCHW out, matching Transition.forward (eval mode)
# ---------------------------------------------------------------------------
def transition_forward(x_nchw, gamma, beta, running_mean, running_var, conv_w,
                       *, eps=1e-5, interpret=False):
    """x_nchw: (N, Cin, H, W) f32.  conv_w: (Cin, Cout) == torch weight[:, :, 0, 0].T"""
    N, Cin, H, W = x_nchw.shape
    Cout = conv_w.shape[1]
    Ho, Wo = H // 2, W // 2

    # Fold eval-mode BatchNorm into per-channel scale/bias (folding stays in f32).
    scale = gamma / jnp.sqrt(running_var + eps)
    bias = beta - running_mean * scale

    # Pad Cin to a multiple of 32 so K4 = 4*Cin_p is a multiple of 128 (unmasked lane loads).
    Cin_p = ((Cin + 31) // 32) * 32
    K4 = 4 * Cin_p

    # Cast to bf16 BEFORE the rearrangement transpose (halves that glue pass's writes),
    # crop odd trailing row/col (AvgPool2d(2,2) semantics), zero-pad channels if needed.
    x = x_nchw[:, :, :2 * Ho, :2 * Wo].astype(jnp.bfloat16)
    if Cin_p != Cin:
        x = jnp.pad(x, ((0, 0), (0, Cin_p - Cin), (0, 0), (0, 0)))

    # NCHW -> (N*Ho*Wo, 4*Cin_p): group each 2x2 pooling window with channels so the
    # average pool becomes part of the matmul contraction. This is the only layout pass.
    xg = x.reshape(N, Cin_p, Ho, 2, Wo, 2)
    xg = jnp.transpose(xg, (0, 2, 4, 3, 5, 1)).reshape(N * Ho * Wo, K4)
    M = N * Ho * Wo

    # Output width: do NOT pad small Cout to 128 (that 8x-inflates the dominant HBM write);
    # only pad when Cout is already large and misaligned.
    if Cout <= 128 or Cout % 128 == 0:
        Cout_b = Cout
    else:
        Cout_b = ((Cout + 127) // 128) * 128

    # Weight: pad channels, tile over the 4 window positions, fold the 1/4 pooling factor.
    w_p = jnp.pad(conv_w, ((0, Cin_p - Cin), (0, 0)))
    w4 = jnp.tile(w_p, (4, 1)) * 0.25
    if Cout_b != Cout:
        w4 = jnp.pad(w4, ((0, 0), (0, Cout_b - Cout)))
    w4 = w4.astype(jnp.bfloat16)

    scale_p = jnp.pad(scale, (0, Cin_p - Cin))
    bias_p = jnp.pad(bias, (0, Cin_p - Cin))
    scale4 = jnp.tile(scale_p, 4).reshape(1, K4).astype(jnp.bfloat16)
    bias4 = jnp.tile(bias_p, 4).reshape(1, K4).astype(jnp.bfloat16)

    vmem_cap = _vmem_capacity_bytes()
    tile_m = _pick_tile_m(M, K4, Cout_b, vmem_cap)
    grid = (pl.cdiv(M, tile_m),)                     # ragged last tile handled by masking

    needed = (2 * tile_m * K4 * 2        # x double-buffer (bf16)
              + 2 * tile_m * Cout_b * 2  # out double-buffer (bf16)
              + 2 * K4 * Cout_b * 2      # weight double-buffer (bf16)
              + 4 * K4 * 2               # scale/bias double-buffer (bf16)
              + tile_m * K4 * 2          # in-kernel z temp (bf16)
              + tile_m * Cout_b * 4)     # in-kernel f32 accumulator
    vmem_limit = int(min(needed + (8 << 20), int(vmem_cap * 0.6)))
    vmem_limit = int(max(vmem_limit, needed + (1 << 20)))

    out = pl.pallas_call(
        _transition_kernel,
        out_shape=jax.ShapeDtypeStruct((M, Cout_b), jnp.bfloat16),
        grid=grid,
        in_specs=[
            pl.BlockSpec((tile_m, K4), lambda i: (i, 0)),
            pl.BlockSpec((K4, Cout_b), lambda i: (0, 0)),
            pl.BlockSpec((1, K4), lambda i: (0, 0)),
            pl.BlockSpec((1, K4), lambda i: (0, 0)),
        ],
        out_specs=pl.BlockSpec((tile_m, Cout_b), lambda i: (i, 0)),
        compiler_params=pltpu.CompilerParams(
            dimension_semantics=("parallel",),
            vmem_limit_bytes=vmem_limit),
        interpret=interpret,
    )(xg, w4, scale4, bias4)

    if Cout_b != Cout:
        out = out[:, :Cout]
    out = out.reshape(N, Ho, Wo, Cout)
    out = jnp.transpose(out, (0, 3, 1, 2))           # back to NCHW (still bf16: cheap move)
    return out.astype(jnp.float32)                   # upcast after the transpose


# ---------------------------------------------------------------------------
# Pure-JAX reference for verification
# ---------------------------------------------------------------------------
def reference(x_nchw, gamma, beta, running_mean, running_var, conv_w, *, eps=1e-5):
    inv = 1.0 / jnp.sqrt(running_var + eps)
    y = (x_nchw - running_mean[None, :, None, None]) * inv[None, :, None, None]
    y = gamma[None, :, None, None] * y + beta[None, :, None, None]
    y = jnp.maximum(y, 0.0)
    y = jnp.einsum("nchw,co->nohw", y, conv_w)
    Nn, Co, H, W = y.shape
    y = y.reshape(Nn, Co, H // 2, 2, W // 2, 2).mean(axis=(3, 5))
    return y


# ---------------------------------------------------------------------------
if __name__ == "__main__":
    N, Cin, H, W = 2, 32, 16, 16
    Cout = 16
    eps = 1e-5

    key = jax.random.PRNGKey(0)
    ks = jax.random.split(key, 6)
    x = jax.random.normal(ks[0], (N, Cin, H, W), dtype=jnp.float32)
    gamma = 1.0 + 0.1 * jax.random.normal(ks[1], (Cin,), dtype=jnp.float32)
    beta = 0.1 * jax.random.normal(ks[2], (Cin,), dtype=jnp.float32)
    running_mean = 0.1 * jax.random.normal(ks[3], (Cin,), dtype=jnp.float32)
    running_var = 1.0 + 0.1 * jax.random.uniform(ks[4], (Cin,), dtype=jnp.float32)
    conv_w = 0.1 * jax.random.normal(ks[5], (Cin, Cout), dtype=jnp.float32)

    out = transition_forward(x, gamma, beta, running_mean, running_var, conv_w, eps=eps)
    out = jax.block_until_ready(out)
    assert out.shape == (N, Cout, H // 2, W // 2), out.shape

    ref = reference(x, gamma, beta, running_mean, running_var, conv_w, eps=eps)
    np.testing.assert_allclose(np.asarray(out), np.asarray(ref), rtol=2e-2, atol=2e-2)

    print("KERNEL_OK")
</pallas_src>

<mosaic_0001>
module attributes {stable_mosaic.version = 11 : i64} {
  func.func @_transition_kernel(%arg0: i32, %arg1: memref<64x128xbf16, #tpu.memory_space<vmem>>, %arg2: memref<128x16xbf16, #tpu.memory_space<vmem>>, %arg3: memref<1x128xbf16, #tpu.memory_space<vmem>>, %arg4: memref<1x128xbf16, #tpu.memory_space<vmem>>, %arg5: memref<64x16xbf16, #tpu.memory_space<vmem>>) attributes {dimension_semantics = [#tpu.dimension_semantics<parallel>], iteration_bounds = array<i64: 2>, scalar_prefetch = 0 : i64, scratch_operands = 0 : i64, tpu.core_type = #tpu.core_type<tc>, window_params = [{transform_indices = @transform_0, window_bounds = array<i64: 64, 128>}, {pipeline_mode = #tpu.pipeline_mode<synchronous>, transform_indices = @transform_1, window_bounds = array<i64: 128, 16>}, {pipeline_mode = #tpu.pipeline_mode<synchronous>, transform_indices = @transform_2, window_bounds = array<i64: 1, 128>}, {pipeline_mode = #tpu.pipeline_mode<synchronous>, transform_indices = @transform_3, window_bounds = array<i64: 1, 128>}, {transform_indices = @transform_4, window_bounds = array<i64: 64, 16>}]} {
    %c0 = arith.constant 0 : index
    %c0_0 = arith.constant 0 : index
    %0 = vector.load %arg1[%c0, %c0_0] : memref<64x128xbf16, #tpu.memory_space<vmem>>, vector<64x128xbf16>
    %c0_1 = arith.constant 0 : index
    %c0_2 = arith.constant 0 : index
    %1 = vector.load %arg3[%c0_1, %c0_2] : memref<1x128xbf16, #tpu.memory_space<vmem>>, vector<1x128xbf16>
    %2 = vector.broadcast %1 : vector<1x128xbf16> to vector<64x128xbf16>
    %3 = arith.mulf %0, %2 : vector<64x128xbf16>
    %c0_3 = arith.constant 0 : index
    %c0_4 = arith.constant 0 : index
    %4 = vector.load %arg4[%c0_3, %c0_4] : memref<1x128xbf16, #tpu.memory_space<vmem>>, vector<1x128xbf16>
    %5 = vector.broadcast %4 : vector<1x128xbf16> to vector<64x128xbf16>
    %6 = arith.addf %3, %5 : vector<64x128xbf16>
    %cst = arith.constant 0.000000e+00 : bf16
    %7 = vector.broadcast %cst : bf16 to vector<64x128xbf16>
    %8 = arith.maximumf %6, %7 : vector<64x128xbf16>
    %c0_5 = arith.constant 0 : index
    %c0_6 = arith.constant 0 : index
    %9 = vector.load %arg2[%c0_5, %c0_6] : memref<128x16xbf16, #tpu.memory_space<vmem>>, vector<128x16xbf16>
    %cst_7 = arith.constant dense<0.000000e+00> : vector<64x16xf32>
    %10 = tpu.matmul %8, %9, %cst_7 {dimension_numbers = #tpu.dot_dimension_numbers<[1], [0], [0], [1], [0, 0, 1, 1], [], []>} : vector<64x128xbf16>, vector<128x16xbf16>, vector<64x16xf32> -> vector<64x16xf32>
    %11 = arith.truncf %10 : vector<64x16xf32> to vector<64x16xbf16>
    %c0_8 = arith.constant 0 : index
    %c0_9 = arith.constant 0 : index
    %12 = vector.load %arg5[%c0_8, %c0_9] : memref<64x16xbf16, #tpu.memory_space<vmem>>, vector<64x16xbf16>
    tpu.vector_store %arg5[%c0_8, %c0_9], %11 {strides = array<i32>} : memref<64x16xbf16, #tpu.memory_space<vmem>>, vector<64x16xbf16>,
    return
  }
  func.func @transform_0(%arg0: i32) -> (i32, i32) {
    %c0_i32 = arith.constant 0 : i32
    %c0_i32_0 = arith.constant 0 : i32
    return %arg0, %c0_i32 : i32, i32
  }
  func.func @transform_1(%arg0: i32) -> (i32, i32) {
    %c0_i32 = arith.constant 0 : i32
    %c0_i32_0 = arith.constant 0 : i32
    %c0_i32_1 = arith.constant 0 : i32
    return %c0_i32, %c0_i32_0 : i32, i32
  }
  func.func @transform_2(%arg0: i32) -> (i32, i32) {
    %c0_i32 = arith.constant 0 : i32
    %c0_i32_0 = arith.constant 0 : i32
    %c0_i32_1 = arith.constant 0 : i32
    return %c0_i32, %c0_i32_0 : i32, i32
  }
  func.func @transform_3(%arg0: i32) -> (i32, i32) {
    %c0_i32 = arith.constant 0 : i32
    %c0_i32_0 = arith.constant 0 : i32
    %c0_i32_1 = arith.constant 0 : i32
    return %c0_i32, %c0_i32_0 : i32, i32
  }
  func.func @transform_4(%arg0: i32) -> (i32, i32) {
    %c0_i32 = arith.constant 0 : i32
    %c0_i32_0 = arith.constant 0 : i32
    return %arg0, %c0_i32 : i32, i32
  }
}

</mosaic_0001>

<bundles_post_ra>
// kernel: tpu_custom_call.1
= control target key start
LH: loop header
LB: loop body
LE: loop exit
PB: predicated region body
PF: predicated region fallthrough
CT: control target
= control target key end

     0   :  { %s652_s15 = smov 0   ;;  %s714_s0 = inlined_call_operand.vmem [shape: bf16[128,128], index: 0, kind: input, shape index: {}]   ;;  %s715_s1 = inlined_call_operand.vmem [shape: bf16[128,16], index: 1, kind: input, shape index: {}]   ;;  %s716_s2 = inlined_call_operand.vmem [shape: bf16[1,128], index: 2, kind: input, shape index: {}]   ;;  %s717_s3 = inlined_call_operand.vmem [shape: bf16[1,128], index: 3, kind: input, shape index: {}]   ;;  %s718_s4 = inlined_call_operand.vmem [shape: bf16[128,16], index: 4, kind: output, shape index: {}]  }
   0x1 LB: > { %s508_s16 = sadd.s32 4294967295, %s624_s15   ;;  %p512_p0 = scmp.ge.s32.totalorder %s624_s15, 1  ;;  %s624_s15 = sphi %s652_s15, %s14_s15  }
   0x2   : > { %p163_p1 = scmp.lt.s32.totalorder %s624_s15, 3 }
   0x4   : > { %p164_p2 = pnand %p512_p0, %p163_p1 }
   0x5   : > { %v610_v0 = vld [vmem:[%s715_s1] sm:$0xff] (!%p164_p2)   ;;  %s513_s19 = sshll.u32 (!%p164_p2), %s508_s16, 3  ;;  %v214_v1 = vlaneseq (!%p164_p2)  ;;  %v611_v2 = vld [vmem:[%s715_s1 + $0x8] sm:$0xff] (!%p164_p2)   ;;  %v612_v4 = vld [vmem:[%s715_s1 + $0x10] sm:$0xff] (!%p164_p2)   ;;  %v626_v37 = vmov (!%p164_p2), 0   ;;  %vm443_vm0 = vcmask (!%p164_p2), 125952  }
   0x6   : > { %167 = sbr.rel (%p164_p2) target bundleno = 256 (0x100), region = 36  ;;  %p190_p3 = scmp.lt.s32.totalorder (!%p164_p2), %s513_s19, 15  ;;  %561 = vmatprep.subr.bf16.mxu0 (!%p164_p2), %v610_v0  ;;  %585 = vmatprep.subr.bf16.mxu1 (!%p164_p2), %v610_v0  ;;  %v613_v6 = vld [vmem:[%s715_s1 + $0x18] sm:$0xff] (!%p164_p2)   ;;  %v210_v7 = vld [vmem:[%s716_s2] sm:$0x1] (!%p164_p2)  ;;  %v615_v27 = vld [vmem:[%s715_s1 + $0x28] sm:$0xff] (!%p164_p2)  }
   0x7   : > { %562 = vmatpush3.bf16.msra.mxu0 (!%p164_p2), %v610_v0  ;;  %593 = vmatpush3.bf16.msra.mxu1 (!%p164_p2), %v610_v0  ;;  %v215_v3 = vshrl.u32 (!%p164_p2), %v214_v1, 7  ;;  %v212_v8 = vpack.i.b16 (!%p164_p2), %v210_v7, %v210_v7  ;;  %v230_v9 = vld [vmem:[%s717_s3] sm:$0x1] (!%p164_p2)  ;;  %v616_v41 = vld [vmem:[%s715_s1 + $0x30] sm:$0xff] (!%p164_p2)   ;;  %v617_v49 = vld [vmem:[%s715_s1 + $0x38] sm:$0xff] (!%p164_p2)  }
   0x8   : > { %563 = vmatprep.subr.bf16.mxu0 (!%p164_p2), %v611_v2  ;;  %586 = vmatprep.subr.bf16.mxu1 (!%p164_p2), %v611_v2  ;;  %v232_v10 = vpack.i.b16 (!%p164_p2), %v230_v9, %v230_v9  ;;  %v614_v11 = vld [vmem:[%s715_s1 + $0x20] sm:$0xff] (!%p164_p2)  }
   0x9   : > { %v216_v5 = vsub.s32 (!%p164_p2), 0, %v215_v3 }
   0xb   : > { %564 = vmatpush3.bf16.msra.mxu0 (!%p164_p2), %v611_v2  ;;  %594 = vmatpush3.bf16.msra.mxu1 (!%p164_p2), %v611_v2  ;;  %v217_v12 = vrot.slane (!%p164_p2), %v212_v8, %v216_v5  ;;  %v237_v15 = vrot.slane (!%p164_p2), %v232_v10, %v216_v5 }
   0xc   : > { %565 = vmatprep.subr.bf16.mxu0 (!%p164_p2), %v612_v4  ;;  %587 = vmatprep.subr.bf16.mxu1 (!%p164_p2), %v612_v4 }
   0xd   : > { %s720_s19 = smov (!%p190_p3, %s513_s19), 15  ;;  %v517_v17 = vcombine.low %v217_v12, %v217_v12  ;;  %v518_v19 = vcombine.low %v237_v15, %v237_v15 }
   0xe   : > { %s514_s24 = sshll.u32 %s720_s19, 2 }
   0xf   : > { %s193_s5 = scalar_lea.vmem %s714_s0, %s514_s24  ;;  %566 = vmatpush3.bf16.msra.mxu0 %v612_v4  ;;  %595 = vmatpush3.bf16.msra.mxu1 %v612_v4  ;;  %s199_s20 = scalar_lea.vmem %s718_s4, %s514_s24 }
  0x10   : > { %567 = vmatprep.subr.bf16.mxu0 %v613_v6  ;;  %588 = vmatprep.subr.bf16.mxu1 %v613_v6  ;;  %v202_v13 = vld [vmem:[%s193_s5] sm:$0xf]  ;;  %v203_v14 = vld [vmem:[%s193_s5 + $0x4] sm:$0xf]  ;;  %v206_v16 = vld [vmem:[%s193_s5 + $0x10] sm:$0xf] }
  0x11   : > { %v207_v18 = vld [vmem:[%s193_s5 + $0x14] sm:$0xf]  ;;  %v204_v20 = vld [vmem:[%s193_s5 + $0x8] sm:$0xf]  ;;  %v222_v21 = vmul.bf16 %v517_v17, %v202_v13  ;;  %v223_v22 = vmul.bf16 %v517_v17, %v203_v14  ;;  %v226_v23 = vmul.bf16 %v517_v17, %v206_v16  ;;  %v205_v24 = vld [vmem:[%s193_s5 + $0xc] sm:$0xf] }
  0x12   : > { %v208_v25 = vld [vmem:[%s193_s5 + $0x18] sm:$0xf]  ;;  %v209_v26 = vld [vmem:[%s193_s5 + $0x1c] sm:$0xf]  ;;  %v227_v28 = vmul.bf16 %v517_v17, %v207_v18  ;;  %v224_v32 = vmul.bf16 %v517_v17, %v204_v20  ;;  %v225_v34 = vmul.bf16 %v517_v17, %v205_v24 }
  0x13   : > { %568 = vmatpush3.bf16.msra.mxu0 %v613_v6  ;;  %596 = vmatpush3.bf16.msra.mxu1 %v613_v6  ;;  %v242_v29 = vadd.bf16 %v518_v19, %v222_v21  ;;  %v243_v30 = vadd.bf16 %v518_v19, %v223_v22  ;;  %v246_v31 = vadd.bf16 %v518_v19, %v226_v23 }
  0x14   : > { %569 = vmatprep.subr.bf16.mxu0 %v614_v11  ;;  %589 = vmatprep.subr.bf16.mxu1 %v614_v11  ;;  %v247_v33 = vadd.bf16 %v518_v19, %v227_v28  ;;  %v228_v35 = vmul.bf16 %v517_v17, %v208_v25  ;;  %v229_v36 = vmul.bf16 %v517_v17, %v209_v26 }
  0x15   : > { %v250_v38 = vmax.bf16 %v626_v37, %v242_v29  ;;  %v251_v39 = vmax.bf16 %v626_v37, %v243_v30  ;;  %v254_v40 = vmax.bf16 %v626_v37, %v246_v31  ;;  %v244_v44 = vadd.bf16 %v518_v19, %v224_v32 }
  0x16   : > { %v255_v42 = vmax.bf16 %v626_v37, %v247_v33  ;;  %v245_v46 = vadd.bf16 %v518_v19, %v225_v34  ;;  %v248_v47 = vadd.bf16 %v518_v19, %v228_v35  ;;  %v249_v48 = vadd.bf16 %v518_v19, %v229_v36 }
  0x17   : > { %570 = vmatpush3.bf16.msra.mxu0 %v614_v11  ;;  %597 = vmatpush3.bf16.msra.mxu1 %v614_v11  ;;  %v519_v43 = vcombine.low %v250_v38, %v251_v39  ;;  %v252_v50 = vmax.bf16 %v626_v37, %v244_v44 }
  0x18   : > { %571 = vmatprep.subr.bf16.mxu0 %v615_v27  ;;  %590 = vmatprep.subr.bf16.mxu1 %v615_v27  ;;  %v521_v45 = vcombine.low %v254_v40, %v255_v42  ;;  %v253_v51 = vmax.bf16 %v626_v37, %v245_v46  ;;  %v256_v52 = vmax.bf16 %v626_v37, %v248_v47 }
  0x19   : > { %577 = vmatprep.mubr.bf16.mxu0 %v519_v43  ;;  %v257_v53 = vmax.bf16 %v626_v37, %v249_v48 }
  0x1a   : > { %581 = vmatprep.mubr.bf16.mxu1 %v521_v45  ;;  %v520_v54 = vcombine.low %v252_v50, %v253_v51 }
  0x1b   : > { %572 = vmatpush3.bf16.msra.mxu0 %v615_v27  ;;  %598 = vmatpush3.bf16.msra.mxu1 %v615_v27  ;;  %v522_v55 = vcombine.low %v256_v52, %v257_v53 }
  0x1c   : > { %573 = vmatprep.subr.bf16.mxu0 %v616_v41  ;;  %591 = vmatprep.subr.bf16.mxu1 %v616_v41 }
  0x1f   : > { %574 = vmatpush3.bf16.msra.mxu0 %v616_v41  ;;  %599 = vmatpush3.bf16.msra.mxu1 %v616_v41 }
  0x20   : > { %575 = vmatprep.subr.bf16.mxu0 %v617_v49  ;;  %592 = vmatprep.subr.bf16.mxu1 %v617_v49 }
  0x23   : > { %576 = vmatpush3.bf16.msra.mxu0 %v617_v49  ;;  %600 = vmatpush3.bf16.msra.mxu1 %v617_v49 }
  0x26   : > { %578 = vmatmul.mubr.bf16.vlgmr.msra.gmra.mrb[0].mxu0 %v520_v54  ;;  %582 = vmatmul.mubr.bf16.vlgmr.msra.gmra.mrb[0].mxu1 %v522_v55 }
  0xf9   : > { %v579_v56 = vpop.f32.mrb[0].mxu0  ;;  %v583_v57 = vpop.f32.mrb[0].mxu1 }
  0xfa   : > { %v543_v58 = vpack.c.bf16 %v579_v56, %v579_v56  ;;  %v547_v59 = vpack.c.bf16 %v583_v57, %v583_v57  ;;  %v380_v60 = vpop.f32.mrb[1].mxu0  ;;  %v396_v61 = vpop.f32.mrb[1].mxu1 }
  0xfb   : > { %v541_v62 = vpack.c.bf16 %v380_v60, %v380_v60  ;;  %v545_v63 = vpack.c.bf16 %v396_v61, %v396_v61  ;;  %v580_v0 = vpop.f32.mrb[2].mxu0  ;;  %v584_v1 = vpop.f32.mrb[2].mxu1 }
  0xfc   : > { %446 = vst.msk [vmem:[%s199_s20 + $0x8] sm:$0xf] %vm443_vm0, %v543_v58  ;;  %450 = vst.msk [vmem:[%s199_s20 + $0x18] sm:$0xf] %vm443_vm0, %v547_v59  ;;  %v544_v2 = vpack.c.bf16 %v580_v0, %v580_v0  ;;  %v548_v3 = vpack.c.bf16 %v584_v1, %v584_v1  ;;  %v383_v4 = vpop.f32.mrb[3].mxu0  ;;  %v399_v5 = vpop.f32.mrb[3].mxu1 }
  0xfd   : > { %444 = vst.msk [vmem:[%s199_s20] sm:$0xf] %vm443_vm0, %v541_v62  ;;  %448 = vst.msk [vmem:[%s199_s20 + $0x10] sm:$0xf] %vm443_vm0, %v545_v63  ;;  %v542_v6 = vpack.c.bf16 %v383_v4, %v383_v4  ;;  %v546_v7 = vpack.c.bf16 %v399_v5, %v399_v5 }
  0xfe   : > { %447 = vst.msk [vmem:[%s199_s20 + $0xc] sm:$0xf] %vm443_vm0, %v544_v2  ;;  %451 = vst.msk [vmem:[%s199_s20 + $0x1c] sm:$0xf] %vm443_vm0, %v548_v3 }
  0xff   : > { %445 = vst.msk [vmem:[%s199_s20 + $0x4] sm:$0xf] %vm443_vm0, %v542_v6  ;;  %449 = vst.msk [vmem:[%s199_s20 + $0x14] sm:$0xf] %vm443_vm0, %v546_v7 }
 0x100 PF: > { %s14_s15 = sadd.s32 1, %s624_s15  }
 0x101   : > { %p11_p4 = scmp.ge.s32.totalorder %s14_s15, 4  }
 0x103   :  { %13 = sbr.rel (!%p11_p4) target bundleno = 1 (0x1), region = 66 }

</bundles_post_ra>
